<compile_context>
chip_gen: v5e
topology: v5e:2x2
jax: 0.10.0
libtpu: 0.0.40
codegen_flags: <defaults>
</compile_context>

<pallas_src>
import jax
import jax.numpy as jnp
import numpy as np
from jax import lax
from jax.experimental import pallas as pl
from jax.experimental.pallas import tpu as pltpu


def bayesreg_kernel(params_ref, x_ref, y_ref):
    """One batch tile.

    params_ref : VMEM (2, D) f32   row0 = sampled weight, row1 = sampled bias (bcast)
    x_ref      : VMEM (TILE_B, D) f32
    y_ref      : VMEM (1, TILE_B) f32   lane-dense output tile
    """
    w = params_ref[0:1, :]        # (1, D)   sampled weight
    b = params_ref[1:2, 0:1]      # (1, 1)   sampled bias

    # Matvec as (1, D) . (TILE_B, D)^T on the MXU -> (1, TILE_B): batch on the
    # lane axis, so the result store is lane-dense (no masked partial stores).
    y = lax.dot_general(
        w, x_ref[...],
        dimension_numbers=(((1,), (1,)), ((), ())),
        preferred_element_type=jnp.float32,
        precision=lax.Precision.HIGHEST,
    )                                                         # (1, TILE_B)
    y_ref[...] = y + b                                        # bcast bias


def _round_up(v, m):
    return ((v + m - 1) // m) * m


def bayesian_regression(x, weight_mean, weight_scale, bias_mean, bias_scale,
                        key, *, tile_b=512):
    """x: (B, D) float32. Returns (out (B,), weight_sample (D,), bias_sample ())."""
    x = jnp.asarray(x, jnp.float32)
    B, D = x.shape

    # --- Reparameterized Gaussian draws (pyro.sample equivalents), wrapper-side.
    kw, kb = jax.random.split(key)
    w_sample = (jnp.asarray(weight_mean, jnp.float32).reshape(D)
                + jnp.asarray(weight_scale, jnp.float32).reshape(D)
                * jax.random.normal(kw, (D,), jnp.float32))                 # (D,)
    b_sample = (jnp.asarray(bias_mean, jnp.float32).reshape(())
                + jnp.asarray(bias_scale, jnp.float32).reshape(())
                * jax.random.normal(kb, (), jnp.float32))                   # ()

    # Pack sampled weight + bias into one tiny (2, D) slab for the kernel.
    params = jnp.stack([w_sample, jnp.broadcast_to(b_sample, (D,))], axis=0)  # (2, D)

    # --- Tile sizing: multiple of 128, clamped to the batch and to a
    # conservative double-buffer VMEM budget (safe on v5e's 16 MiB scoped).
    tile_b = max(128, (int(tile_b) // 128) * 128)
    tile_b = min(tile_b, _round_up(B, 128))
    vmem_budget = 8 * 1024 * 1024                       # x double-buffer budget
    max_tile_vmem = max(128, (vmem_budget // (2 * D * 4) // 128) * 128)
    tile_b = min(tile_b, max_tile_vmem)
    num_tiles = pl.cdiv(B, tile_b)

    y = pl.pallas_call(
        bayesreg_kernel,
        out_shape=jax.ShapeDtypeStruct((1, B), jnp.float32),
        grid_spec=pltpu.PrefetchScalarGridSpec(
            num_scalar_prefetch=0,
            grid=(num_tiles,),
            in_specs=[
                pl.BlockSpec((2, D), lambda i: (0, 0)),          # packed sample slab
                pl.BlockSpec((tile_b, D), lambda i: (i, 0)),     # x batch tile (streamed)
            ],
            out_specs=pl.BlockSpec((1, tile_b), lambda i: (0, i)),  # lane-dense y tile
        ),
        compiler_params=pltpu.CompilerParams(
            dimension_semantics=("parallel",)),                  # v7x: shard tiles over 2 TCs
        cost_estimate=pl.CostEstimate(
            flops=2 * B * D, transcendentals=0,
            bytes_accessed=4 * B * D + 4 * B + 2 * 4 * D),
    )(params, x)

    return y[0, :], w_sample, b_sample


if __name__ == "__main__":
    # Small but TPU-friendly shapes: batch=256, input_dim=128.
    B, D = 256, 128

    key = jax.random.PRNGKey(0)
    kx, ksample = jax.random.split(key)
    x = jax.random.normal(kx, (B, D), dtype=jnp.float32)

    # nn.Parameter init values from the module's __init__.
    weight_mean = jnp.zeros((D,), jnp.float32)
    weight_scale = jnp.ones((D,), jnp.float32)
    bias_mean = jnp.zeros((1,), jnp.float32)
    bias_scale = jnp.ones((1,), jnp.float32)

    out, w_s, b_s = bayesian_regression(x, weight_mean, weight_scale,
                                        bias_mean, bias_scale, ksample)
    out = jax.block_until_ready(out)
    assert out.shape == (B,)

    # Reference uses the exact weight/bias sample the wrapper drew, computed in
    # float64 on host -> checks the fused matvec + bias inside the kernel.
    ref = np.asarray(x, np.float64) @ np.asarray(w_s, np.float64) + float(b_s)
    np.testing.assert_allclose(np.asarray(out, np.float64), ref,
                               rtol=1e-4, atol=1e-4)

    # Sanity on the drawn samples themselves.
    assert np.isfinite(np.asarray(w_s)).all() and np.isfinite(float(b_s))
    print("KERNEL_OK")
</pallas_src>

<mosaic_0001>
module attributes {stable_mosaic.version = 11 : i64} {
  func.func @bayesreg_kernel(%arg0: i32, %arg1: memref<2x128xf32, #tpu.memory_space<vmem>>, %arg2: memref<256x128xf32, #tpu.memory_space<vmem>>, %arg3: memref<1x256xf32, #tpu.memory_space<vmem>>) attributes {dimension_semantics = [#tpu.dimension_semantics<parallel>], iteration_bounds = array<i64: 1>, scalar_prefetch = 0 : i64, scratch_operands = 0 : i64, tpu.core_type = #tpu.core_type<tc>, window_params = [{pipeline_mode = #tpu.pipeline_mode<synchronous>, transform_indices = @transform_0, window_bounds = array<i64: 2, 128>}, {transform_indices = @transform_1, window_bounds = array<i64: 256, 128>}, {transform_indices = @transform_2, window_bounds = array<i64: 1, 256>}]} {
    %c0 = arith.constant 0 : index
    %c0_0 = arith.constant 0 : index
    %0 = vector.load %arg1[%c0, %c0_0] : memref<2x128xf32, #tpu.memory_space<vmem>>, vector<1x128xf32>
    %c1 = arith.constant 1 : index
    %c0_1 = arith.constant 0 : index
    %1 = vector.load %arg1[%c1, %c0_1] : memref<2x128xf32, #tpu.memory_space<vmem>>, vector<1x1xf32>
    %c0_2 = arith.constant 0 : index
    %c0_3 = arith.constant 0 : index
    %2 = vector.load %arg2[%c0_2, %c0_3] : memref<256x128xf32, #tpu.memory_space<vmem>>, vector<256x128xf32>
    %cst = arith.constant dense<0.000000e+00> : vector<1x256xf32>
    %3 = tpu.matmul %0, %2, %cst {dimension_numbers = #tpu.dot_dimension_numbers<[1], [1], [0], [0], [0, 0, 1, 0], [], []>, precision = #tpu.contract_precision<fp32>} : vector<1x128xf32>, vector<256x128xf32>, vector<1x256xf32> -> vector<1x256xf32>
    %4 = vector.broadcast %1 : vector<1x1xf32> to vector<1x256xf32>
    %5 = arith.addf %3, %4 : vector<1x256xf32>
    %c0_4 = arith.constant 0 : index
    %c0_5 = arith.constant 0 : index
    %6 = vector.load %arg3[%c0_4, %c0_5] : memref<1x256xf32, #tpu.memory_space<vmem>>, vector<1x256xf32>
    tpu.vector_store %arg3[%c0_4, %c0_5], %5 {strides = array<i32>} : memref<1x256xf32, #tpu.memory_space<vmem>>, vector<1x256xf32>,
    return
  }
  func.func @transform_0(%arg0: i32) -> (i32, i32) {
    %c0_i32 = arith.constant 0 : i32
    %c0_i32_0 = arith.constant 0 : i32
    %c0_i32_1 = arith.constant 0 : i32
    return %c0_i32, %c0_i32_0 : i32, i32
  }
  func.func @transform_1(%arg0: i32) -> (i32, i32) {
    %c0_i32 = arith.constant 0 : i32
    %c0_i32_0 = arith.constant 0 : i32
    return %arg0, %c0_i32 : i32, i32
  }
  func.func @transform_2(%arg0: i32) -> (i32, i32) {
    %c0_i32 = arith.constant 0 : i32
    %c0_i32_0 = arith.constant 0 : i32
    return %c0_i32, %arg0 : i32, i32
  }
}

</mosaic_0001>

<bundles_post_ra>
// kernel: tpu_custom_call.1
= control target key start
LH: loop header
LB: loop body
LE: loop exit
PB: predicated region body
PF: predicated region fallthrough
CT: control target
= control target key end

     0   :  { %7 = vsyncpa [#allocation3], 0  ;;  %s1411_s0 = inlined_call_operand.hbm [shape: f32[2,128], index: 0, kind: input, shape index: {}]   ;;  %s1412_s1 = inlined_call_operand.hbm [shape: f32[256,128], index: 1, kind: input, shape index: {}]   ;;  %s1413_s2 = inlined_call_operand.hbm [shape: f32[1,256], index: 2, kind: output, shape index: {}]  }
   0x1   :  { %8 = vsyncpa [#allocation6], 0 }
   0x2   :  { %9 = vsyncpa [#allocation4], 0  ;;  %s15_s11 = sshll.u32 %s1411_s0, 4  ;;  %s877_s12 = smov [#allocation2]   ;;  %s16_s11 = int_to_ptr.hbm [resolvable:$true] %s15_s11 }
   0x3   :  { %s17_s13 = sshll.u32 %s877_s12, 4  ;;  %s25_s16 = sshll.u32 %s1412_s1, 4  ;;  %s18_s13 = int_to_ptr.vmem [resolvable:$true] %s17_s13  ;;  %s26_s16 = int_to_ptr.hbm [resolvable:$true] %s25_s16 }
   0x4   :  { %20 = dma.hbm_to_vmem [thread:$0]  %s16_s11, 32, %s18_s13, [#allocation3]  }
   0x5   :  { %s878_s17 = smov [#allocation5]   ;;  %s879_s19 = smov 128  }
   0x6   :  { %s27_s18 = sshll.u32 %s878_s17, 4  ;;  %s880_s20 = smov 8   ;;  %s28_s18 = int_to_ptr.vmem [resolvable:$true] %s27_s18 }
   0x7   :  { %33 = dma.hbm_to_vmem [thread:$0]  %s26_s16, 4096, %s28_s18, [#allocation6], %s879_s19, %s879_s19, %s880_s20  }
   0x8   :  { %871 = dma.done.wait [#allocation3], 32  }
   0x9   :  { %872 = vsyncadd [#allocation3], 4294967264 }
   0xa   :  { %873 = dma.done.wait [#allocation6], 4096  }
   0xb   :  { %874 = vsyncadd [#allocation6], 4294963200  ;;  %v59_v0 = vld [vmem:[#allocation5 + $0x78] sm:$0xff]  ;;  %v58_v1 = vld [vmem:[#allocation5 + $0x70] sm:$0xff]  ;;  %s882_s0 = smov [#allocation7]   ;;  %s781_s23 = sshll.u32 %s1413_s2, 4  ;;  %s782_s23 = int_to_ptr.hbm [resolvable:$true] %s781_s23 }
   0xc   :  { %v57_v2 = vld [vmem:[#allocation5 + $0x68] sm:$0xff]  ;;  %v904_v3 = vand.u32 4294901760, %v59_v0  ;;  %v906_v4 = vand.u32 4294901760, %v58_v1  ;;  %v56_v6 = vld [vmem:[#allocation5 + $0x60] sm:$0xff]  ;;  %v55_v11 = vld [vmem:[#allocation5 + $0x58] sm:$0xff]  ;;  %s779_s1 = sshll.u32 %s882_s0, 4  ;;  %s780_s1 = int_to_ptr.vmem [resolvable:$true] %s779_s1 }
   0xd   :  { %v908_v5 = vand.u32 4294901760, %v57_v2  ;;  %v921_v10 = vand.u32 4294901760, %v56_v6  ;;  %v926_v14 = vand.u32 4294901760, %v55_v11  ;;  %v54_v19 = vld [vmem:[#allocation5 + $0x50] sm:$0xff]  ;;  %v53_v26 = vld [vmem:[#allocation5 + $0x48] sm:$0xff]  ;;  %v52_v32 = vld [vmem:[#allocation5 + $0x40] sm:$0xff] }
   0xe   :  { %v911_v7 = vsub.f32 %v59_v0, %v904_v3  ;;  %82 = vmatpush.xpose.msra.mxu0 %v904_v3  ;;  %278 = vmatpush.xpose.msra.mxu3 %v904_v3  ;;  %v916_v8 = vsub.f32 %v58_v1, %v906_v4  ;;  %v941_v21 = vand.u32 4294901760, %v54_v19  ;;  %v953_v27 = vand.u32 4294901760, %v53_v26  ;;  %v51_v38 = vld [vmem:[#allocation5 + $0x38] sm:$0xff]  ;;  %v50_v44 = vld [vmem:[#allocation5 + $0x30] sm:$0xff]  ;;  %v49_v50 = vld [vmem:[#allocation5 + $0x28] sm:$0xff] }
   0xf   :  { %v919_v9 = vsub.f32 %v57_v2, %v908_v5  ;;  %v938_v18 = vsub.f32 %v56_v6, %v921_v10  ;;  %v949_v25 = vsub.f32 %v55_v11, %v926_v14  ;;  %v965_v33 = vand.u32 4294901760, %v52_v32  ;;  %v48_v56 = vld [vmem:[#allocation5 + $0x20] sm:$0xff]  ;;  %v47_v62 = vld [vmem:[#allocation5 + $0x18] sm:$0xff]  ;;  %v46_v11 = vld [vmem:[#allocation5 + $0x10] sm:$0xff] }
  0x10   :  { %225 = vmatpush.xpose.msra.mxu2 %v911_v7  ;;  %v124_v12 = vand.u32 4294901760, %v911_v7  ;;  %v130_v13 = vand.u32 4294901760, %v916_v8  ;;  %v961_v31 = vsub.f32 %v54_v19, %v941_v21  ;;  %v973_v37 = vsub.f32 %v53_v26, %v953_v27  ;;  %v45_v26 = vld [vmem:[#allocation5 + $0x8] sm:$0xff] }
  0x11   :  { %v136_v17 = vand.u32 4294901760, %v919_v9  ;;  %v142_v24 = vand.u32 4294901760, %v938_v18  ;;  %v148_v30 = vand.u32 4294901760, %v949_v25  ;;  %v978_v39 = vsub.f32 %v52_v32, %v965_v33  ;;  %v74_v32 = vld [vmem:[#allocation5 + $0xf0] sm:$0xff] }
  0x12   :  { %v125_v15 = vsub.f32 %v911_v7, %v124_v12  ;;  %84 = vmatpush.xpose.msra.mxu0 %v906_v4  ;;  %280 = vmatpush.xpose.msra.mxu3 %v906_v4  ;;  %v131_v16 = vsub.f32 %v916_v8, %v130_v13  ;;  %v154_v36 = vand.u32 4294901760, %v961_v31  ;;  %v160_v42 = vand.u32 4294901760, %v973_v37 }
  0x13   :  { %v137_v23 = vsub.f32 %v919_v9, %v136_v17  ;;  %v143_v29 = vsub.f32 %v938_v18, %v142_v24  ;;  %v149_v35 = vsub.f32 %v949_v25, %v148_v30  ;;  %v985_v43 = vand.u32 4294901760, %v51_v38 }
  0x14   :  { %v126_v20 = vand.u32 4294901760, %v125_v15  ;;  %228 = vmatpush.xpose.msra.mxu2 %v916_v8  ;;  %v132_v22 = vand.u32 4294901760, %v131_v16  ;;  %v155_v41 = vsub.f32 %v961_v31, %v154_v36  ;;  %v166_v45 = vand.u32 4294901760, %v978_v39  ;;  %v75_v16 = vld [vmem:[#allocation5 + $0xf8] sm:$0xff] }
  0x15   :  { %v138_v28 = vand.u32 4294901760, %v137_v23  ;;  %v144_v34 = vand.u32 4294901760, %v143_v29  ;;  %v150_v40 = vand.u32 4294901760, %v149_v35  ;;  %v161_v47 = vsub.f32 %v973_v37, %v160_v42 }
  0x16   :  { %127 = vmatpush.xpose.msra.mxu1 %v126_v20  ;;  %86 = vmatpush.xpose.msra.mxu0 %v908_v5  ;;  %v156_v46 = vand.u32 4294901760, %v155_v41  ;;  %v995_v48 = vsub.f32 %v51_v38, %v985_v43  ;;  %v997_v49 = vand.u32 4294901760, %v50_v44  ;;  %v167_v51 = vsub.f32 %v978_v39, %v166_v45  ;;  %v44_v41 = vld [vmem:[#allocation5] sm:$0xff] }
  0x17   :  { %282 = vmatpush.xpose.msra.mxu3 %v908_v5  ;;  %v162_v52 = vand.u32 4294901760, %v161_v47  ;;  %v1009_v55 = vand.u32 4294901760, %v49_v50  ;;  %v1013_v57 = vand.u32 4294901760, %v48_v56  ;;  %v1033_v6 = vand.u32 4294901760, %v47_v62  ;;  %v73_v47 = vld [vmem:[#allocation5 + $0xe8] sm:$0xff] }
  0x18   :  { %231 = vmatpush.xpose.msra.mxu2 %v919_v9  ;;  %v172_v53 = vand.u32 4294901760, %v995_v48  ;;  %v1007_v54 = vsub.f32 %v50_v44, %v997_v49  ;;  %v168_v58 = vand.u32 4294901760, %v167_v51  ;;  %v1045_v23 = vand.u32 4294901760, %v46_v11 }
  0x19   :  { %v1021_v61 = vsub.f32 %v49_v50, %v1009_v55  ;;  %v1026_v63 = vsub.f32 %v48_v56, %v1013_v57  ;;  %vm766_vm0 = vcmask 1040384  }
  0x1a   :  { %133 = vmatpush.xpose.msra.mxu1 %v132_v22  ;;  %88 = vmatpush.xpose.msra.mxu0 %v921_v10  ;;  %v173_v59 = vsub.f32 %v995_v48, %v172_v53  ;;  %v1423_v60 = vand.u32 4294901760, %v1007_v54  ;;  %v1043_v22 = vsub.f32 %v47_v62, %v1033_v6  ;;  %v1057_v38 = vsub.f32 %v46_v11, %v1045_v23 }
  0x1b   :  { %284 = vmatpush.xpose.msra.mxu3 %v921_v10  ;;  %v1419_v2 = vand.u32 4294901760, %v1021_v61  ;;  %v1417_v15 = vand.u32 4294901760, %v1026_v63 }
  0x1c   :  { %234 = vmatpush.xpose.msra.mxu2 %v938_v18  ;;  %v174_v0 = vand.u32 4294901760, %v173_v59  ;;  %v179_v1 = vsub.f32 %v1007_v54, %v1423_v60  ;;  %v1416_v35 = vand.u32 4294901760, %v1043_v22  ;;  %v1079_v59 = vand.u32 4294901760, %v73_v47  ;;  %v68_v60 = vld [vmem:[#allocation5 + $0xc0] sm:$0xff] }
  0x1d   :  { %v185_v20 = vsub.f32 %v1021_v61, %v1419_v2  ;;  %v191_v29 = vsub.f32 %v1026_v63, %v1417_v15  ;;  %v70_v15 = vld [vmem:[#allocation5 + $0xd0] sm:$0xff]  ;;  %v1154_v8 = vand.u32 4294901760, %v68_v60 }
  0x1e   :  { %139 = vmatpush.xpose.msra.mxu1 %v138_v28  ;;  %90 = vmatpush.xpose.msra.mxu0 %v926_v14  ;;  %v180_v19 = vand.u32 4294901760, %v179_v1  ;;  %v1049_v28 = vand.u32 4294901760, %v75_v16  ;;  %v197_v51 = vsub.f32 %v1043_v22, %v1416_v35  ;;  %v72_v1 = vld [vmem:[#allocation5 + $0xe0] sm:$0xff] }
  0x1f   :  { %286 = vmatpush.xpose.msra.mxu3 %v926_v14  ;;  %v192_v50 = vand.u32 4294901760, %v191_v29 }
  0x20   :  { %237 = vmatpush.xpose.msra.mxu2 %v949_v25  ;;  %v1064_v44 = vsub.f32 %v75_v16, %v1049_v28  ;;  %v198_v11 = vand.u32 4294901760, %v197_v51 }
  0x22   :  { %145 = vmatpush.xpose.msra.mxu1 %v144_v34  ;;  %92 = vmatpush.xpose.msra.mxu0 %v941_v21  ;;  %v186_v34 = vand.u32 4294901760, %v185_v20  ;;  %v1415_v62 = vand.u32 4294901760, %v1064_v44 }
  0x23   :  { %288 = vmatpush.xpose.msra.mxu3 %v941_v21 }
  0x24   :  { %240 = vmatpush.xpose.msra.mxu2 %v961_v31  ;;  %v466_v29 = vsub.f32 %v1064_v44, %v1415_v62 }
  0x26   :  { %151 = vmatpush.xpose.msra.mxu1 %v150_v40  ;;  %94 = vmatpush.xpose.msra.mxu0 %v953_v27  ;;  %v1059_v40 = vand.u32 4294901760, %v45_v26  ;;  %v467_v62 = vand.u32 4294901760, %v466_v29 }
  0x27   :  { %290 = vmatpush.xpose.msra.mxu3 %v953_v27 }
  0x28   :  { %243 = vmatpush.xpose.msra.mxu2 %v973_v37  ;;  %v1074_v56 = vsub.f32 %v45_v26, %v1059_v40  ;;  %v1096_v26 = vsub.f32 %v73_v47, %v1079_v59 }
  0x2a   :  { %157 = vmatpush.xpose.msra.mxu1 %v156_v46  ;;  %96 = vmatpush.xpose.msra.mxu0 %v965_v33  ;;  %v1066_v46 = vand.u32 4294901760, %v74_v32 }
  0x2b   :  { %292 = vmatpush.xpose.msra.mxu3 %v965_v33 }
  0x2c   :  { %246 = vmatpush.xpose.msra.mxu2 %v978_v39  ;;  %v62_v39 = vld [vmem:[#allocation5 + $0x90] sm:$0xff] }
  0x2e   :  { %163 = vmatpush.xpose.msra.mxu1 %v162_v52  ;;  %98 = vmatpush.xpose.msra.mxu0 %v985_v43  ;;  %v1414_v52 = vand.u32 4294901760, %v1057_v38 }
  0x2f   :  { %294 = vmatpush.xpose.msra.mxu3 %v985_v43 }
  0x30   :  { %249 = vmatpush.xpose.msra.mxu2 %v995_v48  ;;  %v203_v16 = vsub.f32 %v1057_v38, %v1414_v52  ;;  %v1422_v52 = vand.u32 4294901760, %v1096_v26  ;;  %v1428_v48 = vand.u32 4294901760, %v1007_v54 }
  0x32   :  { %169 = vmatpush.xpose.msra.mxu1 %v168_v58  ;;  %100 = vmatpush.xpose.msra.mxu0 %v997_v49  ;;  %v1076_v58 = vand.u32 4294901760, %v44_v41  ;;  %v204_v51 = vand.u32 4294901760, %v203_v16 }
  0x33   :  { %296 = vmatpush.xpose.msra.mxu3 %v997_v49 }
  0x34   :  { %252 = vmatpush.xpose.msra.mxu2 %v1007_v54  ;;  %v1092_v20 = vsub.f32 %v44_v41, %v1076_v58 }
  0x36   :  { %175 = vmatpush.xpose.msra.mxu1 %v174_v0  ;;  %102 = vmatpush.xpose.msra.mxu0 %v1009_v55  ;;  %v1084_v0 = vsub.f32 %v74_v32, %v1066_v46  ;;  %v1421_v47 = vand.u32 4294901760, %v1092_v20 }
  0x37   :  { %298 = vmatpush.xpose.msra.mxu3 %v1009_v55 }
  0x38   :  { %255 = vmatpush.xpose.msra.mxu2 %v1021_v61  ;;  %v1420_v32 = vand.u32 4294901760, %v1084_v0  ;;  %v215_v2 = vsub.f32 %v1092_v20, %v1421_v47  ;;  %v69_v47 = vld [vmem:[#allocation5 + $0xc8] sm:$0xff] }
  0x3a   :  { %181 = vmatpush.xpose.msra.mxu1 %v180_v19  ;;  %104 = vmatpush.xpose.msra.mxu0 %v1013_v57  ;;  %v1418_v19 = vand.u32 4294901760, %v1074_v56  ;;  %v216_v7 = vand.u32 4294901760, %v215_v2 }
  0x3b   :  { %300 = vmatpush.xpose.msra.mxu3 %v1013_v57 }
  0x3c   :  { %258 = vmatpush.xpose.msra.mxu2 %v1026_v63  ;;  %v209_v41 = vsub.f32 %v1074_v56, %v1418_v19 }
  0x3e   :  { %187 = vmatpush.xpose.msra.mxu1 %v186_v34  ;;  %106 = vmatpush.xpose.msra.mxu0 %v1033_v6  ;;  %v1103_v34 = vand.u32 4294901760, %v72_v1  ;;  %v210_v19 = vand.u32 4294901760, %v209_v41 }
  0x3f   :  { %302 = vmatpush.xpose.msra.mxu3 %v1033_v6 }
  0x40   :  { %261 = vmatpush.xpose.msra.mxu2 %v1043_v22  ;;  %v1117_v16 = vsub.f32 %v72_v1, %v1103_v34  ;;  %v478_v1 = vsub.f32 %v1096_v26, %v1422_v52  ;;  %v1148_v52 = vand.u32 4294901760, %v69_v47 }
  0x42   :  { %193 = vmatpush.xpose.msra.mxu1 %v192_v50  ;;  %108 = vmatpush.xpose.msra.mxu0 %v1045_v23  ;;  %v71_v50 = vld [vmem:[#allocation5 + $0xd8] sm:$0xff] }
  0x43   :  { %304 = vmatpush.xpose.msra.mxu3 %v1045_v23  ;;  %v1119_v35 = vand.u32 4294901760, %v71_v50 }
  0x44   :  { %264 = vmatpush.xpose.msra.mxu2 %v1057_v38 }
  0x45   :  { %v1134_v41 = vsub.f32 %v71_v50, %v1119_v35 }
  0x46   :  { %199 = vmatpush.xpose.msra.mxu1 %v198_v11  ;;  %110 = vmatpush.xpose.msra.mxu0 %v1059_v40  ;;  %v472_v11 = vsub.f32 %v1084_v0, %v1420_v32  ;;  %v1136_v32 = vand.u32 4294901760, %v70_v15 }
  0x47   :  { %306 = vmatpush.xpose.msra.mxu3 %v1059_v40 }
  0x48   :  { %267 = vmatpush.xpose.msra.mxu2 %v1074_v56  ;;  %v473_v29 = vand.u32 4294901760, %v472_v11  ;;  %v489_v11 = vand.u32 4294901760, %v1134_v41  ;;  %v1146_v50 = vsub.f32 %v70_v15, %v1136_v32 }
  0x4a   :  { %205 = vmatpush.xpose.msra.mxu1 %v204_v51  ;;  %112 = vmatpush.xpose.msra.mxu0 %v1076_v58  ;;  %v483_v51 = vand.u32 4294901760, %v1117_v16  ;;  %v490_v2 = vsub.f32 %v1134_v41, %v489_v11  ;;  %v495_v15 = vand.u32 4294901760, %v1146_v50 }
  0x4b   :  { %308 = vmatpush.xpose.msra.mxu3 %v1076_v58 }
  0x4c   :  { %270 = vmatpush.xpose.msra.mxu2 %v1092_v20  ;;  %v491_v9 = vand.u32 4294901760, %v490_v2 }
  0x4e   :  { %319 = vmatpush.xpose.msrb.mxu0 %v124_v12  ;;  %211 = vmatpush.xpose.msra.mxu1 %v210_v19  ;;  %v479_v12 = vand.u32 4294901760, %v478_v1  ;;  %v1161_v19 = vsub.f32 %v69_v47, %v1148_v52  ;;  %v67_v1 = vld [vmem:[#allocation5 + $0xb8] sm:$0xff] }
  0x4f   :  { %468 = vmatpush.xpose.msrb.mxu3 %v467_v62  ;;  %v484_v62 = vsub.f32 %v1117_v16, %v483_v51 }
  0x50   :  { %423 = vmatpush.xpose.msrb.mxu2 %v1049_v28  ;;  %v501_v47 = vand.u32 4294901760, %v1161_v19 }
  0x52   :  { %323 = vmatpush.xpose.msrb.mxu0 %v130_v13  ;;  %217 = vmatpush.xpose.msra.mxu1 %v216_v7  ;;  %v485_v13 = vand.u32 4294901760, %v484_v62  ;;  %v66_v7 = vld [vmem:[#allocation5 + $0xb0] sm:$0xff]  ;;  %v65_v62 = vld [vmem:[#allocation5 + $0xa8] sm:$0xff] }
  0x53   :  { %474 = vmatpush.xpose.msrb.mxu3 %v473_v29  ;;  %v1174_v29 = vand.u32 4294901760, %v67_v1  ;;  %v1200_v2 = vand.u32 4294901760, %v65_v62 }
  0x54   :  { %425 = vmatpush.xpose.msrb.mxu2 %v1066_v46 }
  0x56   :  { %386 = vmatpush.xpose.msrb.mxu1 %v904_v3  ;;  %327 = vmatpush.xpose.msrb.mxu0 %v136_v17  ;;  %v1168_v3 = vsub.f32 %v68_v60, %v1154_v8  ;;  %v496_v17 = vsub.f32 %v1146_v50, %v495_v15  ;;  %v1185_v60 = vsub.f32 %v67_v1, %v1174_v29  ;;  %v64_v1 = vld [vmem:[#allocation5 + $0xa0] sm:$0xff] }
  0x57   :  { %480 = vmatpush.xpose.msrb.mxu3 %v479_v12  ;;  %v1187_v12 = vand.u32 4294901760, %v66_v7  ;;  %v1206_v31 = vand.u32 4294901760, %v64_v1 }
  0x58   :  { %427 = vmatpush.xpose.msrb.mxu2 %v1079_v59  ;;  %v497_v18 = vand.u32 4294901760, %v496_v17 }
  0x59   :  { %v1226_v37 = vsub.f32 %v64_v1, %v1206_v31 }
  0x5a   :  { %388 = vmatpush.xpose.msrb.mxu1 %v906_v4  ;;  %331 = vmatpush.xpose.msrb.mxu0 %v142_v24  ;;  %v507_v4 = vand.u32 4294901760, %v1168_v3  ;;  %v502_v24 = vsub.f32 %v1161_v19, %v501_v47 }
  0x5b   :  { %486 = vmatpush.xpose.msrb.mxu3 %v485_v13  ;;  %v1198_v13 = vsub.f32 %v66_v7, %v1187_v12  ;;  %v1213_v7 = vsub.f32 %v65_v62, %v1200_v2  ;;  %v1427_v1 = vand.u32 4294901760, %v1226_v37 }
  0x5c   :  { %429 = vmatpush.xpose.msrb.mxu2 %v1103_v34  ;;  %v503_v25 = vand.u32 4294901760, %v502_v24 }
  0x5d   :  { %v1424_v17 = vand.u32 4294901760, %v1198_v13 }
  0x5e   :  { %390 = vmatpush.xpose.msrb.mxu1 %v908_v5  ;;  %335 = vmatpush.xpose.msrb.mxu0 %v148_v30  ;;  %v508_v5 = vsub.f32 %v1168_v3, %v507_v4  ;;  %v1425_v30 = vand.u32 4294901760, %v1185_v60 }
  0x5f   :  { %492 = vmatpush.xpose.msrb.mxu3 %v491_v9 }
  0x60   :  { %431 = vmatpush.xpose.msrb.mxu2 %v1119_v35  ;;  %v514_v9 = vsub.f32 %v1185_v60, %v1425_v30 }
  0x62   :  { %392 = vmatpush.xpose.msrb.mxu1 %v921_v10  ;;  %339 = vmatpush.xpose.msrb.mxu0 %v154_v36  ;;  %v509_v10 = vand.u32 4294901760, %v508_v5  ;;  %v42_v36 = vld [vmem:[#allocation2] sm:$0x1]  ;;  %v515_v62 = vand.u32 4294901760, %v514_v9  ;;  %v520_v5 = vsub.f32 %v1198_v13, %v1424_v17  ;;  %v1252_v17 = vand.u32 4294901760, %v62_v39 }
  0x63   :  { %498 = vmatpush.xpose.msrb.mxu3 %v497_v18  ;;  %v63_v18 = vld [vmem:[#allocation5 + $0x98] sm:$0xff]  ;;  %v1215_v24 = vand.u32 4294901760, %v42_v36 }
  0x64   :  { %433 = vmatpush.xpose.msrb.mxu2 %v1136_v32 }
  0x65   :  { %219 = vmatmul.f32.vlgmr.msra.gmra.mxu1 %v1215_v24 }
  0x66   :  { %394 = vmatpush.xpose.msrb.mxu1 %v926_v14  ;;  %343 = vmatpush.xpose.msrb.mxu0 %v160_v42  ;;  %v1219_v14 = vsub.f32 %v42_v36, %v1215_v24  ;;  %v1228_v42 = vand.u32 4294901760, %v63_v18  ;;  %v521_v36 = vand.u32 4294901760, %v520_v5  ;;  %v1266_v5 = vsub.f32 %v62_v39, %v1252_v17 }
  0x67   :  { %504 = vmatpush.xpose.msrb.mxu3 %v503_v25  ;;  %v1426_v25 = vand.u32 4294901760, %v1213_v7 }
  0x68   :  { %435 = vmatpush.xpose.msrb.mxu2 %v1148_v52 }
  0x69   :  { %273 = vmatmul.f32.vlgmr.msra.gmra.mxu2 %v1219_v14  ;;  %v526_v9 = vsub.f32 %v1213_v7, %v1426_v25  ;;  %v60_v25 = vld [vmem:[#allocation5 + $0x80] sm:$0xff] }
  0x6a   :  { %396 = vmatpush.xpose.msrb.mxu1 %v941_v21  ;;  %347 = vmatpush.xpose.msrb.mxu0 %v166_v45  ;;  %v1236_v21 = vand.u32 4294901760, %v1219_v14 }
  0x6b   :  { %510 = vmatpush.xpose.msrb.mxu3 %v509_v10  ;;  %v1247_v10 = vsub.f32 %v63_v18, %v1228_v42 }
  0x6c   :  { %437 = vmatpush.xpose.msrb.mxu2 %v1154_v8  ;;  %v116_v45 = vsub.f32 %v1219_v14, %v1236_v21  ;;  %312 = vmatmul.f32.vlgmr.msra.gmra.mxu3 %v1236_v21 }
  0x6d   :  { %v537_v18 = vand.u32 4294901760, %v1247_v10 }
  0x6e   :  { %398 = vmatpush.xpose.msrb.mxu1 %v953_v27  ;;  %351 = vmatpush.xpose.msrb.mxu0 %v172_v53  ;;  %v1254_v30 = vand.u32 4294901760, %v116_v45  ;;  %v61_v27 = vld [vmem:[#allocation5 + $0x88] sm:$0xff]  ;;  %v532_v53 = vsub.f32 %v1226_v37, %v1427_v1  ;;  %v881_v1 = vmov 0  }
  0x6f   :  { %516 = vmatpush.xpose.msrb.mxu3 %v515_v62  ;;  %v527_v62 = vand.u32 4294901760, %v526_v9  ;;  %v1268_v45 = vand.u32 4294901760, %v61_v27  ;;  %v1281_v9 = vand.u32 4294901760, %v60_v25  ;;  %798 = vset.pattern.permute.xlu0 %v881_v1 }
  0x70   :  { %439 = vmatpush.xpose.msrb.mxu2 %v1174_v29  ;;  %118 = vmatmul.f32.vlgmr.msra.gmra.mxu0 %v1254_v30  ;;  %v533_v54 = vand.u32 4294901760, %v532_v53 }
  0x71   :  { %v1279_v39 = vsub.f32 %v61_v27, %v1268_v45 }
  0x72   :  { %400 = vmatpush.xpose.msrb.mxu1 %v965_v33  ;;  %355 = vmatpush.xpose.msrb.mxu0 %v1428_v48  ;;  %v1429_v33 = vand.u32 4294901760, %v1021_v61  ;;  %v538_v48 = vsub.f32 %v1247_v10, %v537_v18 }
  0x73   :  { %522 = vmatpush.xpose.msrb.mxu3 %v521_v36  ;;  %v543_v36 = vand.u32 4294901760, %v1266_v5  ;;  %v549_v27 = vand.u32 4294901760, %v1279_v39 }
  0x74   :  { %441 = vmatpush.xpose.msrb.mxu2 %v1187_v12  ;;  %v539_v61 = vand.u32 4294901760, %v538_v48  ;;  %v1433_v48 = vand.u32 4294901760, %v1074_v56 }
  0x75   :  { %v544_v53 = vsub.f32 %v1266_v5, %v543_v36  ;;  %v550_v1 = vsub.f32 %v1279_v39, %v549_v27 }
  0x76   :  { %402 = vmatpush.xpose.msrb.mxu1 %v985_v43  ;;  %359 = vmatpush.xpose.msrb.mxu0 %v1429_v33  ;;  %v1430_v43 = vand.u32 4294901760, %v1026_v63  ;;  %v43_v33 = vld [vmem:[#allocation2 + $0x1] sm:$0x1] }
  0x77   :  { %528 = vmatpush.xpose.msrb.mxu3 %v527_v62  ;;  %v1292_v62 = vsub.f32 %v60_v25, %v1281_v9  ;;  %78 = vperm.xlu0 %798, %v43_v33   ;;  %v545_v63 = vand.u32 4294901760, %v544_v53  ;;  %v1432_v25 = vand.u32 4294901760, %v1057_v38  ;;  %v1437_v38 = vand.u32 4294901760, %v1096_v26 }
  0x78   :  { %443 = vmatpush.xpose.msrb.mxu2 %v1200_v2 }
  0x7a   :  { %404 = vmatpush.xpose.msrb.mxu1 %v997_v49  ;;  %363 = vmatpush.xpose.msrb.mxu0 %v1430_v43  ;;  %v1431_v49 = vand.u32 4294901760, %v1043_v22 }
  0x7b   :  { %534 = vmatpush.xpose.msrb.mxu3 %v533_v54  ;;  %v555_v54 = vand.u32 4294901760, %v1292_v62 }
  0x7c   :  { %445 = vmatpush.xpose.msrb.mxu2 %v1206_v31 }
  0x7d   :  { %v556_v22 = vsub.f32 %v1292_v62, %v555_v54 }
  0x7e   :  { %406 = vmatpush.xpose.msrb.mxu1 %v1009_v55  ;;  %367 = vmatpush.xpose.msrb.mxu0 %v1431_v49  ;;  %v551_v55 = vand.u32 4294901760, %v550_v1 }
  0x7f   :  { %540 = vmatpush.xpose.msrb.mxu3 %v539_v61  ;;  %v557_v43 = vand.u32 4294901760, %v556_v22 }
  0x80   :  { %447 = vmatpush.xpose.msrb.mxu2 %v1228_v42 }
  0x82   :  { %408 = vmatpush.xpose.msrb.mxu1 %v1013_v57  ;;  %371 = vmatpush.xpose.msrb.mxu0 %v1432_v25  ;;  %v1434_v57 = vand.u32 4294901760, %v1092_v20 }
  0x83   :  { %546 = vmatpush.xpose.msrb.mxu3 %v545_v63 }
  0x84   :  { %449 = vmatpush.xpose.msrb.mxu2 %v1252_v17 }
  0x86   :  { %410 = vmatpush.xpose.msrb.mxu1 %v1033_v6  ;;  %375 = vmatpush.xpose.msrb.mxu0 %v1433_v48  ;;  %v1435_v6 = vand.u32 4294901760, %v1064_v44 }
  0x87   :  { %552 = vmatpush.xpose.msrb.mxu3 %v551_v55 }
  0x88   :  { %451 = vmatpush.xpose.msrb.mxu2 %v1268_v45 }
  0x8a   :  { %412 = vmatpush.xpose.msrb.mxu1 %v1045_v23  ;;  %379 = vmatpush.xpose.msrb.mxu0 %v1434_v57  ;;  %v1436_v23 = vand.u32 4294901760, %v1084_v0 }
  0x8b   :  { %558 = vmatpush.xpose.msrb.mxu3 %v557_v43 }
  0x8c   :  { %453 = vmatpush.xpose.msrb.mxu2 %v1281_v9 }
  0x8d   :  { %381 = vmatmul.f32.vlgmr.msrb.gmra.mxu0 %v1215_v24 }
  0x8e   :  { %566 = vmatpush.xpose.msra.mxu0 %v1064_v44  ;;  %414 = vmatpush.xpose.msrb.mxu1 %v1059_v40  ;;  %v1440_v40 = vand.u32 4294901760, %v1213_v7  ;;  %v1441_v44 = vand.u32 4294901760, %v1226_v37 }
  0x8f   :  { %727 = vmatpush.xpose.msra.mxu3 %v1049_v28  ;;  %459 = vmatmul.f32.vlgmr.msrb.gmra.mxu2 %v1254_v30 }
  0x90   :  { %660 = vmatpush.xpose.msra.mxu2 %v1435_v6  ;;  %560 = vmatmul.f32.vlgmr.msrb.gmra.mxu3 %v1215_v24 }
  0x92   :  { %569 = vmatpush.xpose.msra.mxu0 %v1084_v0  ;;  %416 = vmatpush.xpose.msrb.mxu1 %v1076_v58 }
  0x93   :  { %729 = vmatpush.xpose.msra.mxu3 %v1066_v46 }
  0x94   :  { %664 = vmatpush.xpose.msra.mxu2 %v1436_v23 }
  0x95   :  { %418 = vmatmul.f32.vlgmr.msrb.gmra.mxu1 %v1215_v24 }
  0x96   :  { %619 = vmatpush.xpose.msra.mxu1 %v1049_v28  ;;  %572 = vmatpush.xpose.msra.mxu0 %v1096_v26  ;;  %v1438_v28 = vand.u32 4294901760, %v1185_v60 }
  0x97   :  { %731 = vmatpush.xpose.msra.mxu3 %v1079_v59 }
  0x98   :  { %668 = vmatpush.xpose.msra.mxu2 %v1437_v38 }
  0x9a   :  { %621 = vmatpush.xpose.msra.mxu1 %v1066_v46  ;;  %575 = vmatpush.xpose.msra.mxu0 %v1117_v16 }
  0x9b   :  { %733 = vmatpush.xpose.msra.mxu3 %v1103_v34 }
  0x9c   :  { %672 = vmatpush.xpose.msra.mxu2 %v483_v51 }
  0x9e   :  { %623 = vmatpush.xpose.msra.mxu1 %v1079_v59  ;;  %578 = vmatpush.xpose.msra.mxu0 %v1134_v41 }
  0x9f   :  { %735 = vmatpush.xpose.msra.mxu3 %v1119_v35 }
  0xa0   :  { %676 = vmatpush.xpose.msra.mxu2 %v489_v11 }
  0xa2   :  { %625 = vmatpush.xpose.msra.mxu1 %v1103_v34  ;;  %581 = vmatpush.xpose.msra.mxu0 %v1146_v50 }
  0xa3   :  { %737 = vmatpush.xpose.msra.mxu3 %v1136_v32 }
  0xa4   :  { %680 = vmatpush.xpose.msra.mxu2 %v495_v15 }
  0xa6   :  { %627 = vmatpush.xpose.msra.mxu1 %v1119_v35  ;;  %584 = vmatpush.xpose.msra.mxu0 %v1161_v19  ;;  %v1439_v35 = vand.u32 4294901760, %v1198_v13 }
  0xa7   :  { %739 = vmatpush.xpose.msra.mxu3 %v1148_v52 }
  0xa8   :  { %684 = vmatpush.xpose.msra.mxu2 %v501_v47 }
  0xaa   :  { %629 = vmatpush.xpose.msra.mxu1 %v1136_v32  ;;  %587 = vmatpush.xpose.msra.mxu0 %v1168_v3 }
  0xab   :  { %741 = vmatpush.xpose.msra.mxu3 %v1154_v8 }
  0xac   :  { %688 = vmatpush.xpose.msra.mxu2 %v507_v4 }
  0xae   :  { %631 = vmatpush.xpose.msra.mxu1 %v1148_v52  ;;  %590 = vmatpush.xpose.msra.mxu0 %v1185_v60 }
  0xaf   :  { %743 = vmatpush.xpose.msra.mxu3 %v1174_v29 }
  0xb0   :  { %692 = vmatpush.xpose.msra.mxu2 %v1438_v28 }
  0xb2   :  { %633 = vmatpush.xpose.msra.mxu1 %v1154_v8  ;;  %593 = vmatpush.xpose.msra.mxu0 %v1198_v13 }
  0xb3   :  { %745 = vmatpush.xpose.msra.mxu3 %v1187_v12 }
  0xb4   :  { %696 = vmatpush.xpose.msra.mxu2 %v1439_v35 }
  0xb6   :  { %635 = vmatpush.xpose.msra.mxu1 %v1174_v29  ;;  %596 = vmatpush.xpose.msra.mxu0 %v1213_v7 }
  0xb7   :  { %747 = vmatpush.xpose.msra.mxu3 %v1200_v2 }
  0xb8   :  { %700 = vmatpush.xpose.msra.mxu2 %v1440_v40 }
  0xba   :  { %637 = vmatpush.xpose.msra.mxu1 %v1187_v12  ;;  %599 = vmatpush.xpose.msra.mxu0 %v1226_v37  ;;  %v769_v12 = vlaneseq }
  0xbb   :  { %749 = vmatpush.xpose.msra.mxu3 %v1206_v31 }
  0xbc   :  { %704 = vmatpush.xpose.msra.mxu2 %v1441_v44  ;;  %vm771_vm1 = vcmp.lt.s32.totalorder %v769_v12, 256 }
  0xbe   :  { %639 = vmatpush.xpose.msra.mxu1 %v1200_v2  ;;  %602 = vmatpush.xpose.msra.mxu0 %v1247_v10 }
  0xbf   :  { %751 = vmatpush.xpose.msra.mxu3 %v1228_v42 }
  0xc0   :  { %708 = vmatpush.xpose.msra.mxu2 %v537_v18 }
  0xc2   :  { %641 = vmatpush.xpose.msra.mxu1 %v1206_v31  ;;  %605 = vmatpush.xpose.msra.mxu0 %v1266_v5 }
  0xc3   :  { %753 = vmatpush.xpose.msra.mxu3 %v1252_v17 }
  0xc4   :  { %712 = vmatpush.xpose.msra.mxu2 %v543_v36 }
  0xc6   :  { %643 = vmatpush.xpose.msra.mxu1 %v1228_v42  ;;  %608 = vmatpush.xpose.msra.mxu0 %v1279_v39 }
  0xc7   :  { %755 = vmatpush.xpose.msra.mxu3 %v1268_v45 }
  0xc8   :  { %716 = vmatpush.xpose.msra.mxu2 %v549_v27 }
  0xca   :  { %645 = vmatpush.xpose.msra.mxu1 %v1252_v17  ;;  %611 = vmatpush.xpose.msra.mxu0 %v1292_v62 }
  0xcb   :  { %757 = vmatpush.xpose.msra.mxu3 %v1281_v9 }
  0xcc   :  { %720 = vmatpush.xpose.msra.mxu2 %v555_v54 }
  0xcd   :  { %614 = vmatmul.f32.vlgmr.msra.gmra.mxu0 %v1219_v14 }
  0xce   :  { %647 = vmatpush.xpose.msra.mxu1 %v1268_v45  ;;  %759 = vmatmul.f32.vlgmr.msra.gmra.mxu3 %v1215_v24 }
  0xcf   :  { %722 = vmatmul.f32.vlgmr.msra.gmra.mxu2 %v1215_v24 }
  0xd2   :  { %649 = vmatpush.xpose.msra.mxu1 %v1281_v9 }
  0xd5   :  { %653 = vmatmul.f32.vlgmr.msra.gmra.mxu1 %v1236_v21 }
  0xe2   :  { %v220_v56 = vpop.f32.mrf.mxu1 }
  0xe9   :  { %v79_v59 = vpop.permute.xlu0 %78 }
  0xec   :  { %v274_v52 = vpop.f32.mrf.mxu2 }
  0xed   :  { %v119_v46 = vpop.f32.mrf.mxu0 }
  0xee   :  { %v120_v26 = vadd.f32 %v119_v46, %v79_v59 }
  0xef   :  { %v313_v58 = vpop.f32.mrf.mxu3 }
  0xf0   :  { %v221_v16 = vadd.f32 %v220_v56, %v120_v26 }
  0xf2   :  { %v275_v50 = vadd.f32 %v274_v52, %v221_v16 }
  0xf4   :  { %v314_v15 = vadd.f32 %v313_v58, %v275_v50 }
 0x10a   :  { %v382_v0 = vpop.f32.mrf.mxu0 }
 0x10b   :  { %v383_v4 = vadd.f32 %v382_v0, %v314_v15 }
 0x112   :  { %v460_v20 = vpop.f32.mrf.mxu2  ;;  %v419_v51 = vpop.f32.mrf.mxu1 }
 0x113   :  { %v461_v32 = vadd.f32 %v460_v20, %v79_v59  ;;  %v561_v34 = vpop.f32.mrf.mxu3  ;;  %v420_v13 = vadd.f32 %v419_v51, %v383_v4 }
 0x115   :  { %v562_v41 = vadd.f32 %v561_v34, %v461_v32 }
 0x14a   :  { %v615_v11 = vpop.f32.mrf.mxu0 }
 0x14b   :  { %v616_v8 = vadd.f32 %v615_v11, %v562_v41 }
 0x151   :  { %v760_v29 = vpop.f32.mrf.mxu3 }
 0x152   :  { %v654_v19 = vpop.f32.mrf.mxu1  ;;  %v723_v3 = vpop.f32.mrf.mxu2 }
 0x153   :  { %v655_v47 = vadd.f32 %v654_v19, %v616_v8 }
 0x155   :  { %v724_v60 = vadd.f32 %v723_v3, %v655_v47 }
 0x157   :  { %v761_v30 = vadd.f32 %v760_v29, %v724_v60 }
 0x159   :  { %v765_v2 = vrot.slane %v761_v30, 7 }
 0x15b   :  { %v767_v31 = vsel %vm766_vm0, %v420_v13, %v765_v2 }
 0x15c   :  { %773 = vst.msk [vmem:[#allocation7] sm:$0x3] %vm771_vm1, %v767_v31 }
 0x15d   :  { %784 = dma.vmem_to_hbm [thread:$0]  %s780_s1, 32, %s782_s23, [#allocation4]  }
 0x15e   :  { %875 = dma.done.wait [#allocation4], 32  }
 0x15f   :  { %876 = vsyncadd [#allocation4], 4294967264 }
 0x160   :  { %789 = vsyncpa [#allocation3], 1 }
 0x161   :  { %790 = vsyncpa [#allocation6], 1 }
 0x162   :  { %791 = vsyncpa [#allocation4], 1 }

</bundles_post_ra>
